<compile_context>
chip_gen: v7x
topology: tpu7x:2x2x1
jax: 0.10.0
libtpu: 0.0.40
codegen_flags: <defaults>
</compile_context>

<pallas_src>
import functools

import jax
import jax.numpy as jnp
from jax.experimental import pallas as pl
from jax.experimental.pallas import tpu as pltpu

_SUBLANE = 8
_LANE = 128


def _round_up(x, m):
    return (x + m - 1) // m * m


def _vmem_budget_bytes():
    """Scoped-VMEM budget derived from physical VMEM, with compiler headroom."""
    try:
        cap = pltpu.get_tpu_info().vmem_capacity_bytes
    except Exception:
        cap = 64 * 1024 * 1024          # conservative default (v7x per-TC size)
    return int(cap * 3 // 4)            # ~48 MiB on v7x, ~96 MiB on v5e/v6e


def _squeeze_input(x):
    """x.squeeze() as MyMLP uses it: (batch, close_size, 1) -> (batch, close_size).

    NOTE: torch's x.squeeze() drops ALL size-1 dims; we intentionally only drop
    the trailing one so a batch of 1 (or close_size of 1) keeps its 2-D
    (batch, features) layout.
    """
    if x.ndim >= 2 and x.shape[-1] == 1:
        x = jnp.squeeze(x, axis=-1)
    return x.reshape(x.shape[0], -1)


def prepare_params(params, compute_dtype=jnp.bfloat16):
    """One-time parameter prep (hoisted out of the per-forward-call path).

    params: list of (W, b) with W: (in, out) [pre-transposed vs torch], b: (out,)
    Weights are cast to `compute_dtype` (bf16 default: ~2-4x MXU throughput,
    half the HBM/VMEM footprint); biases stay f32 so the bias-add/ReLU epilogue
    runs on the f32 accumulator.
    """
    flat = []
    dims = [int(jnp.asarray(params[0][0]).shape[0])]
    resident_bytes = 0
    for w, b in params:
        w = jnp.asarray(w, compute_dtype)
        b = jnp.asarray(b, jnp.float32).reshape(1, -1)
        flat += [w, b]
        dims.append(int(w.shape[1]))
        resident_bytes += int(w.size) * w.dtype.itemsize + int(b.size) * 4
    return dict(flat=flat, dims=dims, num_linear=len(params),
                compute_dtype=compute_dtype, resident_bytes=resident_bytes)


# ----------------------------------------------------------------------------
# Kernels
# ----------------------------------------------------------------------------
def _fused_mlp_kernel(num_linear, compute_dtype, *refs):
    """All layers fused; activations never leave VMEM/vregs.

    refs = (x_ref, w1, b1, ..., wN, bN, out_ref)
    Matmuls run in compute_dtype on the MXU with f32 accumulation; the
    bias-add / ReLU epilogue stays in f32 and is cast back to compute_dtype
    for the next layer's MXU pass.
    """
    x_ref = refs[0]
    out_ref = refs[-1]
    p = refs[1:-1]

    h = x_ref[...]
    for i in range(num_linear):
        acc = jnp.dot(h, p[2 * i][...], preferred_element_type=jnp.float32)
        acc = acc + p[2 * i + 1][...]
        if i < num_linear - 1:
            h = jnp.maximum(acc, 0.0).astype(compute_dtype)
        else:
            out_ref[...] = acc.astype(out_ref.dtype)


def _linear_kernel(apply_relu, x_ref, w_ref, b_ref, o_ref, acc_ref):
    """One tiled Linear (+ optional ReLU) layer; grid = (M, N, K) tiles."""
    k = pl.program_id(2)

    @pl.when(k == 0)
    def _():
        acc_ref[...] = jnp.zeros_like(acc_ref)

    acc_ref[...] += jnp.dot(x_ref[...], w_ref[...],
                            preferred_element_type=jnp.float32)

    @pl.when(k == pl.num_programs(2) - 1)
    def _():
        r = acc_ref[...] + b_ref[...]
        if apply_relu:
            r = jnp.maximum(r, 0.0)
        o_ref[...] = r.astype(o_ref.dtype)


# ----------------------------------------------------------------------------
# Wrappers
# ----------------------------------------------------------------------------
def _pick_tile(dim, target, align):
    """Largest `align`-multiple <= target that divides dim, else full extent."""
    if dim <= target:
        return dim                      # full-extent blocks are always legal
    t = (target // align) * align
    while t >= align:
        if dim % t == 0:
            return t
        t -= align
    return dim


def _linear_pallas(x2, w, b, *, apply_relu, out_dtype, tm, vmem_budget):
    """Per-layer tiled matmul (fallback when whole-weight residency won't fit)."""
    M, K = x2.shape
    N = w.shape[1]
    tk = _pick_tile(K, 512, _LANE)
    tn = _pick_tile(N, 512, _LANE)
    grid = (M // tm, N // tn, K // tk)

    cost = pl.CostEstimate(
        flops=2 * M * K * N, transcendentals=0,
        bytes_accessed=int(x2.size) * x2.dtype.itemsize
        + int(w.size) * w.dtype.itemsize + int(b.size) * 4
        + M * N * jnp.dtype(out_dtype).itemsize)

    return pl.pallas_call(
        functools.partial(_linear_kernel, apply_relu),
        out_shape=jax.ShapeDtypeStruct((M, N), out_dtype),
        grid=grid,
        in_specs=[pl.BlockSpec((tm, tk), lambda i, j, k: (i, k)),
                  pl.BlockSpec((tk, tn), lambda i, j, k: (k, j)),
                  pl.BlockSpec((1, tn), lambda i, j, k: (0, j))],
        out_specs=pl.BlockSpec((tm, tn), lambda i, j, k: (i, j)),
        scratch_shapes=[pltpu.VMEM((tm, tn), jnp.float32)],
        cost_estimate=cost,
        compiler_params=pltpu.CompilerParams(
            dimension_semantics=("parallel", "parallel", "arbitrary"),
            vmem_limit_bytes=vmem_budget),
    )(x2, w, b)


def mlp_forward(x, prep, *, batch_tile=None, force_layerwise=False):
    """Run the MyMLP forward pass with pre-prepared params.

    x:    (batch, close_size, 1) or (batch, close_size)
    prep: output of prepare_params(params, compute_dtype)
    """
    flat = prep["flat"]
    dims = prep["dims"]
    num_linear = prep["num_linear"]
    cdt = prep["compute_dtype"]
    in_dim, out_dim = dims[0], dims[-1]

    x2 = _squeeze_input(x).astype(cdt)
    batch = x2.shape[0]

    budget = _vmem_budget_bytes()
    if batch_tile is None:
        # Bigger tiles amortize the ~0.35 us/grid-step cost on 128 MiB-VMEM
        # parts (v5e/v6e); keep v7x (64 MiB) at 512.
        batch_tile = 1024 if budget >= 80 * 1024 * 1024 else 512

    # Does the (single-buffered) weight set + double-buffered x/out tiles fit
    # the scoped-VMEM budget?  If not, fall back to per-layer tiled matmuls.
    tile_bytes = 2 * batch_tile * (in_dim * jnp.dtype(cdt).itemsize + out_dim * 4)
    fused_fits = (prep["resident_bytes"] + tile_bytes + (4 << 20)) <= budget

    flops = 2 * batch * sum(dims[i] * dims[i + 1] for i in range(num_linear))
    bytes_accessed = (int(x2.size) * x2.dtype.itemsize
                      + sum(int(a.size) * a.dtype.itemsize for a in flat)
                      + batch * out_dim * 4)
    cost = pl.CostEstimate(flops=flops, transcendentals=0,
                           bytes_accessed=bytes_accessed)

    kernel = functools.partial(_fused_mlp_kernel, num_linear, cdt)

    if force_layerwise or not fused_fits:
        # Fallback: weight set too big for VMEM residency (e.g. real hidden
        # dims on v7x's 64 MiB) -> one tiled-matmul pallas_call per layer.
        tm = min(batch_tile, _round_up(batch, _SUBLANE))
        batch_p = _round_up(batch, tm)
        h = jnp.pad(x2, ((0, batch_p - batch), (0, 0)))
        for i in range(num_linear):
            last = i == num_linear - 1
            h = _linear_pallas(h, flat[2 * i], flat[2 * i + 1],
                               apply_relu=not last,
                               out_dtype=jnp.float32 if last else cdt,
                               tm=tm, vmem_budget=budget)
        return h[:batch]

    if batch <= batch_tile:
        # Small batch: single fused no-grid call, everything VMEM-resident,
        # no padding at all (whole-array operands have no (8,128) constraint).
        vmem = pl.BlockSpec(memory_space=pltpu.MemorySpace.VMEM)
        return pl.pallas_call(
            kernel,
            out_shape=jax.ShapeDtypeStruct((batch, out_dim), jnp.float32),
            in_specs=[vmem] * (1 + len(flat)),
            out_specs=vmem,
            cost_estimate=cost,
            compiler_params=pltpu.CompilerParams(vmem_limit_bytes=budget),
        )(x2, *flat)

    # Large batch: 1-D grid over batch tiles.  Input/output keep their REAL
    # feature widths (no HBM amplification); weights/biases are VMEM-resident
    # (constant index_map), requested single-buffered via pl.Buffered(1).
    tb = batch_tile
    batch_p = _round_up(batch, tb)
    x_p = jnp.pad(x2, ((0, batch_p - batch), (0, 0)))       # single pad

    def _call(buffered_weights):
        if buffered_weights:
            def w_spec(a):
                return pl.BlockSpec(a.shape, lambda i: (0, 0),
                                    pipeline_mode=pl.Buffered(1))
        else:
            def w_spec(a):
                return pl.BlockSpec(a.shape, lambda i: (0, 0))

        in_specs = [pl.BlockSpec((tb, in_dim), lambda i: (i, 0))]
        in_specs += [w_spec(a) for a in flat]
        out_spec = pl.BlockSpec((tb, out_dim), lambda i: (i, 0))

        # TODO(synk): on v7x switch this axis to pltpu.CORE_PARALLEL (and
        # verify both TensorCores are active in the trace); "parallel" is kept
        # here for portability across v5e/v6e/v7x.
        return pl.pallas_call(
            kernel,
            out_shape=jax.ShapeDtypeStruct((batch_p, out_dim), jnp.float32),
            grid=(batch_p // tb,),
            in_specs=in_specs,
            out_specs=out_spec,
            cost_estimate=cost,
            compiler_params=pltpu.CompilerParams(
                dimension_semantics=("parallel",),
                vmem_limit_bytes=budget),
        )(x_p, *flat)

    try:
        out = _call(True)
    except Exception:
        # pipeline_mode / Buffered(1) not supported here: fall back to the
        # default 2-deep buffering (only costs extra VMEM for the weights).
        out = _call(False)
    return out[:batch]


# ----------------------------------------------------------------------------
# Synthetic init + pure-JAX reference (mirrors the kernel's dtype handling)
# ----------------------------------------------------------------------------
def init_params(key, close_size, hidden_dim, out_dim, num_layers):
    """Deterministic synthetic init; shapes follow nn.Linear in MyMLP.__init__."""
    dims = [close_size] + [hidden_dim] * (num_layers - 1) + [out_dim]
    params = []
    for i in range(len(dims) - 1):
        key, kw, kb = jax.random.split(key, 3)
        fan_in, fan_out = dims[i], dims[i + 1]
        bound = 1.0 / jnp.sqrt(fan_in)
        # PyTorch stores weight as (out, in); we keep the transposed (in, out)
        # layout so the kernel can do h @ W directly.
        w = jax.random.uniform(kw, (fan_in, fan_out), jnp.float32, -bound, bound)
        b = jax.random.uniform(kb, (1, fan_out), jnp.float32, -bound, bound)
        params.append((w, b))
    return params


def reference_forward(x, params, compute_dtype=jnp.float32):
    """Pure-JAX reference with the same dtype/accumulation scheme as the kernel."""
    h = _squeeze_input(x).astype(compute_dtype)
    n = len(params)
    for i, (w, b) in enumerate(params):
        acc = jnp.dot(h, jnp.asarray(w, compute_dtype),
                      preferred_element_type=jnp.float32)
        acc = acc + jnp.asarray(b, jnp.float32).reshape(1, -1)
        if i < n - 1:
            h = jnp.maximum(acc, 0.0).astype(compute_dtype)
        else:
            h = acc
    return h


if __name__ == "__main__":
    # args: close_size=8, hidden_dim=32, out_dim=1, num_layers=3
    close_size, hidden_dim, out_dim, num_layers = 8, 32, 1, 3

    key = jax.random.PRNGKey(0)
    key, kx = jax.random.split(key)
    params = init_params(key, close_size, hidden_dim, out_dim, num_layers)

    # One-time parameter prep (hoisted out of the forward path).
    prep_f32 = prepare_params(params, compute_dtype=jnp.float32)
    prep_bf16 = prepare_params(params, compute_dtype=jnp.bfloat16)

    # 1) small batch -> single fused no-grid call, f32 compute (tight check)
    batch = 2
    x = jax.random.normal(kx, (batch, close_size, 1), jnp.float32)
    out = jax.block_until_ready(mlp_forward(x, prep_f32))
    ref = reference_forward(x, params, jnp.float32)
    assert out.shape == (batch, out_dim), out.shape
    assert jnp.allclose(out, ref, atol=1e-5, rtol=1e-5), (out, ref)

    # 2) large batch -> batch-tiled grid, bf16 weights/activations, resident W
    key, kx2 = jax.random.split(key)
    big = 2048
    x_big = jax.random.normal(kx2, (big, close_size, 1), jnp.float32)
    out_big = jax.block_until_ready(mlp_forward(x_big, prep_bf16, batch_tile=512))
    ref_big = reference_forward(x_big, params, jnp.bfloat16)
    assert out_big.shape == (big, out_dim), out_big.shape
    assert jnp.allclose(out_big, ref_big, atol=2e-3, rtol=2e-3)

    # 3) forced per-layer tiled fallback (path used when weights exceed VMEM)
    out_lw = jax.block_until_ready(
        mlp_forward(x_big, prep_f32, batch_tile=512, force_layerwise=True))
    ref_lw = reference_forward(x_big, params, jnp.float32)
    assert out_lw.shape == (big, out_dim), out_lw.shape
    assert jnp.allclose(out_lw, ref_lw, atol=1e-4, rtol=1e-4)

    print("KERNEL_OK")
</pallas_src>

<mosaic_0001>
module attributes {stable_mosaic.version = 11 : i64} {
  func.func @_fused_mlp_kernel(%arg0: memref<2x8xf32, #tpu.memory_space<vmem>>, %arg1: memref<8x32xf32, #tpu.memory_space<vmem>>, %arg2: memref<1x32xf32, #tpu.memory_space<vmem>>, %arg3: memref<32x32xf32, #tpu.memory_space<vmem>>, %arg4: memref<1x32xf32, #tpu.memory_space<vmem>>, %arg5: memref<32x1xf32, #tpu.memory_space<vmem>>, %arg6: memref<1x1xf32, #tpu.memory_space<vmem>>, %arg7: memref<2x1xf32, #tpu.memory_space<vmem>>) attributes {dimension_semantics = [], scalar_prefetch = 0 : i64, scratch_operands = 0 : i64, tpu.core_type = #tpu.core_type<tc>} {
    %c0 = arith.constant 0 : index
    %c0_0 = arith.constant 0 : index
    %0 = vector.load %arg0[%c0, %c0_0] : memref<2x8xf32, #tpu.memory_space<vmem>>, vector<2x8xf32>
    %c0_1 = arith.constant 0 : index
    %c0_2 = arith.constant 0 : index
    %1 = vector.load %arg1[%c0_1, %c0_2] : memref<8x32xf32, #tpu.memory_space<vmem>>, vector<8x32xf32>
    %cst = arith.constant dense<0.000000e+00> : vector<2x32xf32>
    %2 = tpu.matmul %0, %1, %cst {dimension_numbers = #tpu.dot_dimension_numbers<[1], [0], [0], [1], [0, 0, 1, 1], [], []>} : vector<2x8xf32>, vector<8x32xf32>, vector<2x32xf32> -> vector<2x32xf32>
    %c0_3 = arith.constant 0 : index
    %c0_4 = arith.constant 0 : index
    %3 = vector.load %arg2[%c0_3, %c0_4] : memref<1x32xf32, #tpu.memory_space<vmem>>, vector<1x32xf32>
    %4 = vector.broadcast %3 : vector<1x32xf32> to vector<2x32xf32>
    %5 = arith.addf %2, %4 : vector<2x32xf32>
    %cst_5 = arith.constant 0.000000e+00 : f32
    %6 = vector.broadcast %cst_5 : f32 to vector<2x32xf32>
    %7 = arith.maximumf %5, %6 : vector<2x32xf32>
    %c0_6 = arith.constant 0 : index
    %c0_7 = arith.constant 0 : index
    %8 = vector.load %arg3[%c0_6, %c0_7] : memref<32x32xf32, #tpu.memory_space<vmem>>, vector<32x32xf32>
    %cst_8 = arith.constant dense<0.000000e+00> : vector<2x32xf32>
    %9 = tpu.matmul %7, %8, %cst_8 {dimension_numbers = #tpu.dot_dimension_numbers<[1], [0], [0], [1], [0, 0, 1, 1], [], []>} : vector<2x32xf32>, vector<32x32xf32>, vector<2x32xf32> -> vector<2x32xf32>
    %c0_9 = arith.constant 0 : index
    %c0_10 = arith.constant 0 : index
    %10 = vector.load %arg4[%c0_9, %c0_10] : memref<1x32xf32, #tpu.memory_space<vmem>>, vector<1x32xf32>
    %11 = vector.broadcast %10 : vector<1x32xf32> to vector<2x32xf32>
    %12 = arith.addf %9, %11 : vector<2x32xf32>
    %cst_11 = arith.constant 0.000000e+00 : f32
    %13 = vector.broadcast %cst_11 : f32 to vector<2x32xf32>
    %14 = arith.maximumf %12, %13 : vector<2x32xf32>
    %c0_12 = arith.constant 0 : index
    %c0_13 = arith.constant 0 : index
    %15 = vector.load %arg5[%c0_12, %c0_13] : memref<32x1xf32, #tpu.memory_space<vmem>>, vector<32x1xf32>
    %cst_14 = arith.constant dense<0.000000e+00> : vector<2x1xf32>
    %16 = tpu.matmul %14, %15, %cst_14 {dimension_numbers = #tpu.dot_dimension_numbers<[1], [0], [0], [1], [0, 0, 1, 1], [], []>} : vector<2x32xf32>, vector<32x1xf32>, vector<2x1xf32> -> vector<2x1xf32>
    %c0_15 = arith.constant 0 : index
    %c0_16 = arith.constant 0 : index
    %17 = vector.load %arg6[%c0_15, %c0_16] : memref<1x1xf32, #tpu.memory_space<vmem>>, vector<1x1xf32>
    %18 = vector.broadcast %17 : vector<1x1xf32> to vector<2x1xf32>
    %19 = arith.addf %16, %18 : vector<2x1xf32>
    %c0_17 = arith.constant 0 : index
    %c0_18 = arith.constant 0 : index
    %20 = vector.load %arg7[%c0_17, %c0_18] : memref<2x1xf32, #tpu.memory_space<vmem>>, vector<2x1xf32>
    tpu.vector_store %arg7[%c0_17, %c0_18], %19 {strides = array<i32>} : memref<2x1xf32, #tpu.memory_space<vmem>>, vector<2x1xf32>,
    return
  }
}

</mosaic_0001>

<bundles_post_ra>
// kernel: tpu_custom_call.1
= control target key start
LH: loop header
LB: loop body
LE: loop exit
PB: predicated region body
PF: predicated region fallthrough
CT: control target
= control target key end

     0   :  { %vm37_vm0 = vcmask 64512   ;;  %v348_v0 = vmov 0.0   ;;  %vm349_vm1 = vmmov 0   ;;  %v350_v4 = vmov 0.0|0.0   ;;  %s435_s1 = inlined_call_operand.vmem [shape: f32[8,32], index: 1, kind: input, shape index: {}]   ;;  %s436_s0 = inlined_call_operand.vmem [shape: f32[2,8], index: 0, kind: input, shape index: {}]   ;;  %s437_s3 = inlined_call_operand.vmem [shape: f32[32,32], index: 3, kind: input, shape index: {}]   ;;  %s438_s5 = inlined_call_operand.vmem [shape: f32[32,1], index: 5, kind: input, shape index: {}]   ;;  %s439_s2 = inlined_call_operand.vmem [shape: f32[1,32], index: 2, kind: input, shape index: {}]   ;;  %s440_s6 = inlined_call_operand.<no memory space> [shape: f32[1,1], index: 6, kind: input, shape index: {}]   ;;  %s441_s4 = inlined_call_operand.vmem [shape: f32[1,32], index: 4, kind: input, shape index: {}]   ;;  %s442_s7 = inlined_call_operand.vmem [shape: f32[2,1], index: 7, kind: output, shape index: {}]  }
   0x1   :  { %306 = vmatprep.subr.mxu0 %v348_v0  ;;  %v29_v1 = vld [vmem:[%s435_s1] sm:$0xff]  ;;  %308 = vmatprep.mubr.msk.f32.mxu0 %vm349_vm1, %v348_v0  ;;  %v113_v5 = vld [vmem:[%s437_s3 + $0x8] sm:$0xff]  ;;  %v114_v7 = vld [vmem:[%s437_s3 + $0x10] sm:$0xff]  ;;  %vm123_vm2 = vcmask 261120   ;;  %v12_v21 = vstv %s440_s6  ;;  %vm282_vm3 = vcmask 1024  }
   0x2   :  { %v28_v2 = vld [vmem:[%s436_s0] sm:$0x3]  ;;  %307 = vmatpush3.msra.mxu0 %v29_v1  ;;  %333 = vmatprep.subr.bf16.mxu1 %v350_v4  ;;  %v115_v8 = vld [vmem:[%s437_s3 + $0x18] sm:$0xff]  ;;  %v199_v11 = vld [vmem:[%s438_s5 + $0x8] sm:$0xff]  ;;  %13 = vst [vmem:[#allocation2] sm:$0x1] %v12_v21 }
   0x3   :  { %v112_v3 = vld [vmem:[%s437_s3] sm:$0xff]  ;;  %309 = vmatmul.mubr.msk.f32.vlgmr.msra.gmra.mrb[0].mxu0 %vm37_vm0, %v28_v2  ;;  %319 = vmatprep.mubr.msk.f32.mxu1 %vm349_vm1, %v348_v0  ;;  %v337_v9 = vpack.c.bf16 %v115_v8, %v114_v7  ;;  %v200_v18 = vld [vmem:[%s438_s5 + $0x10] sm:$0xff]  ;;  %v201_v19 = vld [vmem:[%s438_s5 + $0x18] sm:$0xff] }
   0x4   :  { %v334_v6 = vpack.c.bf16 %v113_v5, %v112_v3  ;;  %339 = vmatprep.subr.bf16.mxu0 %v350_v4  ;;  %330 = vmatprep.mubr.msk.f32.mxu0 %vm349_vm1, %v348_v0  ;;  %v198_v10 = vld [vmem:[%s438_s5] sm:$0xff]  ;;  %v343_v20 = vpack.c.bf16 %v201_v19, %v200_v18 }
   0x5   :  { %v340_v12 = vpack.c.bf16 %v199_v11, %v198_v10  ;;  %v288_v13 = vld [vmem:[%s439_s2] ss:$0 sm:$0xff] }
   0x6   :  { %335 = vmatpush3.bf16.msra.mxu1 %v334_v6  ;;  %v290_v22 = vld [vmem:[%s441_s4] ss:$0 sm:$0xff] }
   0x7   :  { %336 = vmatprep.subr.bf16.mxu1 %v350_v4  ;;  %341 = vmatpush3.bf16.msra.mxu0 %v340_v12 }
   0x8   :  { %342 = vmatprep.subr.bf16.mxu0 %v350_v4 }
   0x9   :  { %v292_v27 = vld [vmem:[#allocation2] ss:$0 sm:$0xff] }
   0xa   :  { %338 = vmatpush3.bf16.msra.mxu1 %v337_v9 }
   0xb   :  { %344 = vmatpush3.bf16.msra.mxu0 %v343_v20 }
  0xd6   :  { %v107_v14 = vpop.f32.mrb[0].mxu0 }
  0xd7   :  { %v108_v15 = vadd.f32 %v288_v13, %v107_v14  ;;  %v310_v16 = vpop.f32.mrb[1].mxu0 }
  0xd9   :  { %v111_v17 = vmax.f32 %v108_v15, 0.0 }
  0xdb   :  { %320 = vmatmul.mubr.msk.f32.vlgmr.msra.gmra.mrb[0].mxu1 %vm123_vm2, %v111_v17 }
 0x1ae   :  { %v193_v23 = vpop.f32.mrb[0].mxu1 }
 0x1af   :  { %v194_v24 = vadd.f32 %v290_v22, %v193_v23  ;;  %v321_v25 = vpop.f32.mrb[1].mxu1 }
 0x1b1   :  { %v197_v26 = vmax.f32 %v194_v24, 0.0 }
 0x1b3   :  { %331 = vmatmul.mubr.msk.f32.vlgmr.msra.gmra.mrb[2].mxu0 %vm123_vm2, %v197_v26 }
 0x286   :  { %v278_v28 = vpop.f32.mrb[2].mxu0 }
 0x287   :  { %v279_v29 = vadd.f32 %v292_v27, %v278_v28  ;;  %v332_v30 = vpop.f32.mrb[3].mxu0 }
 0x289   :  { %283 = vst.msk [vmem:[%s442_s7] sm:$0x3] %vm282_vm3, %v279_v29 }

</bundles_post_ra>
